<compile_context>
chip_gen: v6e
topology: v6e:2x2x1
jax: 0.10.0
libtpu: 0.0.40
codegen_flags: <defaults>
</compile_context>

<pallas_src>
import math
import jax
import jax.numpy as jnp
from jax.experimental import pallas as pl
from jax.experimental.pallas import tpu as pltpu


def _round_up(x, m):
    return (x + m - 1) // m * m


def _mtl_forward_kernel(task_ref, x_ref, w1_ref, b1_ref, w2_ref, b2_ref, o_ref):
    # x_ref  : (TB, D_in)     in compute dtype (f32 or bf16)
    # w1_ref : (D_in, Hp)     compute dtype      b1_ref : (1, Hp)  f32
    # w2_ref : (Hp, Cp)       compute dtype (task slice, squeezed)
    # b2_ref : (1, Cp)        f32 (task slice, squeezed)
    # o_ref  : (TB, Cp)       f32
    del task_ref  # only used by the index_maps (scalar prefetch)
    h = jnp.dot(x_ref[...], w1_ref[...], preferred_element_type=jnp.float32)
    h = jnp.maximum(h + b1_ref[...], 0.0)
    out = jnp.dot(h.astype(w2_ref.dtype), w2_ref[...],
                  preferred_element_type=jnp.float32)
    o_ref[...] = (out + b2_ref[...]).astype(o_ref.dtype)


def tnrmtl_tt_forward(inputs, task_index, params, *, tile_b=512,
                      compute_dtype=jnp.float32):
    """inputs: (B, input_dim); task_index: python int or int32 scalar.

    Weights in `params` are pre-transposed and zero-padded to lane-dense
    shapes (see init_params). Zero padding keeps the result numerically
    identical to the unpadded module.
    """
    w1 = params["hidden_w"]          # (input_dim, Hp)
    b1 = params["hidden_b"]          # (1, Hp)               f32
    w2 = params["cls_w"]             # (task_num, Hp, Cp)
    b2 = params["cls_b"]             # (task_num, 1, Cp)     f32
    C = params["class_num"]

    if inputs.ndim < 2:
        inputs = inputs[None, :]
    B, D = inputs.shape
    Hp = w1.shape[1]
    Cp = w2.shape[2]

    x = inputs.astype(compute_dtype)
    w1c = w1.astype(compute_dtype)
    w2c = w2.astype(compute_dtype)
    x_item = jnp.dtype(compute_dtype).itemsize

    # ---- batch-tile selection from a VMEM budget --------------------------
    def step_bytes(tb):
        # double-buffered streaming blocks per grid step (x in, out out)
        return 2 * (tb * D * x_item + tb * Cp * 4)

    TB = min(int(tile_b), _round_up(B, 8))
    budget = 48 << 20
    while TB > 8 and step_bytes(TB) > budget:
        TB //= 2
    TB = max(8, (TB // 8) * 8)                     # keep a multiple of 8 rows
    # v7x has 2 TensorCores sharing the 'parallel' grid axis: keep >= 2 steps
    # whenever the batch is large enough to split.
    if B > 8 and _round_up(B, TB) // TB < 2:
        TB = _round_up(pl.cdiv(B, 2), 8)
    B_pad = _round_up(B, TB)
    if B_pad != B:
        x = jnp.pad(x, ((0, B_pad - B), (0, 0)))

    # ---- VMEM limit & cost estimate ---------------------------------------
    weight_bytes = (D * Hp + Hp * Cp) * x_item + (Hp + Cp) * 4
    vmem_limit = int(1.5 * (2 * weight_bytes + step_bytes(TB))) + (4 << 20)
    vmem_limit = max(32 << 20, min(vmem_limit, 64 << 20))

    cost = pl.CostEstimate(
        flops=2 * B_pad * D * Hp + 2 * B_pad * Hp * Cp,
        transcendentals=0,
        bytes_accessed=B_pad * D * x_item + weight_bytes + B_pad * Cp * 4,
    )

    task_arr = jnp.asarray([task_index], dtype=jnp.int32)

    grid_spec = pltpu.PrefetchScalarGridSpec(
        num_scalar_prefetch=1,
        grid=(B_pad // TB,),
        in_specs=[
            pl.BlockSpec((TB, D), lambda i, t: (i, 0)),
            pl.BlockSpec((D, Hp), lambda i, t: (0, 0)),
            pl.BlockSpec((1, Hp), lambda i, t: (0, 0)),
            pl.BlockSpec((pl.Squeezed(), Hp, Cp), lambda i, t: (t[0], 0, 0)),
            pl.BlockSpec((pl.Squeezed(), 1, Cp), lambda i, t: (t[0], 0, 0)),
        ],
        out_specs=pl.BlockSpec((TB, Cp), lambda i, t: (i, 0)),
    )

    out = pl.pallas_call(
        _mtl_forward_kernel,
        out_shape=jax.ShapeDtypeStruct((B_pad, Cp), jnp.float32),
        grid_spec=grid_spec,
        compiler_params=pltpu.CompilerParams(
            dimension_semantics=("parallel",),
            vmem_limit_bytes=vmem_limit),
        cost_estimate=cost,
    )(task_arr, x, w1c, b1, w2c, b2)

    return out[:B, :C]


def init_params(key, input_dim, hidden_dim, class_num, task_num):
    """Deterministic init mirroring the PyTorch module's parameter shapes.

    Stores pre-transposed, zero-padded (lane-dense) copies for the kernel and
    raw PyTorch-layout copies for the reference check.
    """
    k1, k2, k3, k4 = jax.random.split(key, 4)

    # nn.Linear(input_dim, hidden_dim): weight (hidden_dim, input_dim), bias (hidden_dim,)
    bound1 = 1.0 / math.sqrt(input_dim)
    hidden_w_t = jax.random.uniform(k1, (hidden_dim, input_dim), jnp.float32,
                                    -bound1, bound1)
    hidden_b = jax.random.uniform(k2, (hidden_dim,), jnp.float32, -bound1, bound1)

    # cls_weight (task_num, class_num, hidden_dim) kaiming-uniform-ish,
    # cls_bias (task_num, class_num) uniform(-1/sqrt(fan_in), ...)
    fan_in = hidden_dim
    gain = math.sqrt(2.0 / (1.0 + 5.0))           # a = sqrt(5)
    w_bound = gain * math.sqrt(3.0 / fan_in)
    cls_w = jax.random.uniform(k3, (task_num, class_num, hidden_dim), jnp.float32,
                               -w_bound, w_bound)
    b_bound = 1.0 / math.sqrt(fan_in)
    cls_b = jax.random.uniform(k4, (task_num, class_num), jnp.float32,
                               -b_bound, b_bound)

    # Lane-dense padded sizes: hidden -> multiple of 256, classes -> multiple of 128.
    Hp = _round_up(hidden_dim, 256)
    Cp = _round_up(class_num, 128)

    hidden_w_p = jnp.pad(hidden_w_t.T, ((0, 0), (0, Hp - hidden_dim)))
    hidden_b_p = jnp.pad(hidden_b, (0, Hp - hidden_dim))[None, :]
    cls_w_p = jnp.pad(jnp.transpose(cls_w, (0, 2, 1)),
                      ((0, 0), (0, Hp - hidden_dim), (0, Cp - class_num)))
    cls_b_p = jnp.pad(cls_b, ((0, 0), (0, Cp - class_num)))[:, None, :]

    return {
        # padded, pre-transposed for x @ W style matmuls inside the kernel
        "hidden_w": hidden_w_p,                 # (input_dim, Hp)
        "hidden_b": hidden_b_p,                 # (1, Hp)
        "cls_w": cls_w_p,                       # (task_num, Hp, Cp)
        "cls_b": cls_b_p,                       # (task_num, 1, Cp)
        "class_num": class_num,
        "hidden_dim": hidden_dim,
        # raw (PyTorch-layout) copies for the reference check
        "_raw_hidden_w": hidden_w_t, "_raw_hidden_b": hidden_b,
        "_raw_cls_w": cls_w, "_raw_cls_b": cls_b,
    }


def reference_forward(inputs, task_index, params):
    h = jnp.maximum(inputs @ params["_raw_hidden_w"].T + params["_raw_hidden_b"], 0.0)
    w = params["_raw_cls_w"][task_index]
    b = params["_raw_cls_b"][task_index]
    return h @ w.T + b


if __name__ == "__main__":
    # Small shapes consistent with the module (hidden_dim=196 matches the
    # 7*7*4 TT reshape in get_regular_term, though only forward is run here).
    B, INPUT_DIM, HIDDEN_DIM, CLASS_NUM, TASK_NUM = 8, 64, 196, 10, 3
    TASK_INDEX = 1

    key = jax.random.PRNGKey(0)
    kp, kx = jax.random.split(key)
    params = init_params(kp, INPUT_DIM, HIDDEN_DIM, CLASS_NUM, TASK_NUM)
    x = jax.random.normal(kx, (B, INPUT_DIM), dtype=jnp.float32)

    ref = reference_forward(x, TASK_INDEX, params)

    # f32 compute path (exact)
    out_f32 = jax.block_until_ready(tnrmtl_tt_forward(x, TASK_INDEX, params))
    assert out_f32.shape == (B, CLASS_NUM)
    assert jnp.allclose(out_f32, ref, atol=1e-4, rtol=1e-4), "f32 mismatch vs reference"

    # bf16 compute path (halved HBM traffic, f32 accumulation) — loose tolerance
    out_bf16 = jax.block_until_ready(
        tnrmtl_tt_forward(x, TASK_INDEX, params, compute_dtype=jnp.bfloat16))
    assert out_bf16.shape == (B, CLASS_NUM)
    assert jnp.allclose(out_bf16, ref, atol=5e-2, rtol=5e-2), "bf16 mismatch vs reference"

    print("KERNEL_OK")
</pallas_src>

<mosaic_0001>
module attributes {stable_mosaic.version = 11 : i64} {
  func.func @_mtl_forward_kernel(%arg0: i32, %arg1: memref<1xi32, #tpu.memory_space<smem>>, %arg2: memref<8x64xf32, #tpu.memory_space<vmem>>, %arg3: memref<64x256xf32, #tpu.memory_space<vmem>>, %arg4: memref<1x256xf32, #tpu.memory_space<vmem>>, %arg5: memref<1x256x128xf32, #tpu.memory_space<vmem>>, %arg6: memref<1x1x128xf32, #tpu.memory_space<vmem>>, %arg7: memref<8x128xf32, #tpu.memory_space<vmem>>) attributes {dimension_semantics = [#tpu.dimension_semantics<parallel>], iteration_bounds = array<i64: 1>, scalar_prefetch = 1 : i64, scratch_operands = 0 : i64, tpu.core_type = #tpu.core_type<tc>, window_params = [{transform_indices = @transform_0, window_bounds = array<i64: 8, 64>}, {pipeline_mode = #tpu.pipeline_mode<synchronous>, transform_indices = @transform_1, window_bounds = array<i64: 64, 256>}, {pipeline_mode = #tpu.pipeline_mode<synchronous>, transform_indices = @transform_2, window_bounds = array<i64: 1, 256>}, {transform_indices = @transform_3, window_bounds = array<i64: 1, 256, 128>}, {transform_indices = @transform_4, window_bounds = array<i64: 1, 1, 128>}, {transform_indices = @transform_5, window_bounds = array<i64: 8, 128>}]} {
    %c0 = arith.constant 0 : index
    %c0_0 = arith.constant 0 : index
    %0 = vector.load %arg2[%c0, %c0_0] : memref<8x64xf32, #tpu.memory_space<vmem>>, vector<8x64xf32>
    %c0_1 = arith.constant 0 : index
    %c0_2 = arith.constant 0 : index
    %1 = vector.load %arg3[%c0_1, %c0_2] : memref<64x256xf32, #tpu.memory_space<vmem>>, vector<64x256xf32>
    %cst = arith.constant dense<0.000000e+00> : vector<8x256xf32>
    %2 = tpu.matmul %0, %1, %cst {dimension_numbers = #tpu.dot_dimension_numbers<[1], [0], [0], [1], [0, 0, 1, 1], [], []>} : vector<8x64xf32>, vector<64x256xf32>, vector<8x256xf32> -> vector<8x256xf32>
    %c0_3 = arith.constant 0 : index
    %c0_4 = arith.constant 0 : index
    %3 = vector.load %arg4[%c0_3, %c0_4] : memref<1x256xf32, #tpu.memory_space<vmem>>, vector<1x256xf32>
    %4 = vector.broadcast %3 : vector<1x256xf32> to vector<8x256xf32>
    %5 = arith.addf %2, %4 : vector<8x256xf32>
    %cst_5 = arith.constant 0.000000e+00 : f32
    %6 = vector.broadcast %cst_5 : f32 to vector<8x256xf32>
    %7 = arith.maximumf %5, %6 : vector<8x256xf32>
    %c0_6 = arith.constant 0 : index
    %c0_7 = arith.constant 0 : index
    %c0_8 = arith.constant 0 : index
    %8 = vector.load %arg5[%c0_6, %c0_7, %c0_8] : memref<1x256x128xf32, #tpu.memory_space<vmem>>, vector<1x256x128xf32>
    %9 = vector.shape_cast %8 : vector<1x256x128xf32> to vector<256x128xf32>
    %cst_9 = arith.constant dense<0.000000e+00> : vector<8x128xf32>
    %10 = tpu.matmul %7, %9, %cst_9 {dimension_numbers = #tpu.dot_dimension_numbers<[1], [0], [0], [1], [0, 0, 1, 1], [], []>} : vector<8x256xf32>, vector<256x128xf32>, vector<8x128xf32> -> vector<8x128xf32>
    %c0_10 = arith.constant 0 : index
    %c0_11 = arith.constant 0 : index
    %c0_12 = arith.constant 0 : index
    %11 = vector.load %arg6[%c0_10, %c0_11, %c0_12] : memref<1x1x128xf32, #tpu.memory_space<vmem>>, vector<1x1x128xf32>
    %12 = vector.shape_cast %11 : vector<1x1x128xf32> to vector<1x128xf32>
    %13 = vector.broadcast %12 : vector<1x128xf32> to vector<8x128xf32>
    %14 = arith.addf %10, %13 : vector<8x128xf32>
    %c0_13 = arith.constant 0 : index
    %c0_14 = arith.constant 0 : index
    %15 = vector.load %arg7[%c0_13, %c0_14] : memref<8x128xf32, #tpu.memory_space<vmem>>, vector<8x128xf32>
    tpu.vector_store %arg7[%c0_13, %c0_14], %14 {strides = array<i32>} : memref<8x128xf32, #tpu.memory_space<vmem>>, vector<8x128xf32>,
    return
  }
  func.func @transform_0(%arg0: i32, %arg1: memref<1xi32, #tpu.memory_space<smem>>) -> (i32, i32) {
    %c0_i32 = arith.constant 0 : i32
    %c0_i32_0 = arith.constant 0 : i32
    return %arg0, %c0_i32 : i32, i32
  }
  func.func @transform_1(%arg0: i32, %arg1: memref<1xi32, #tpu.memory_space<smem>>) -> (i32, i32) {
    %c0_i32 = arith.constant 0 : i32
    %c0_i32_0 = arith.constant 0 : i32
    %c0_i32_1 = arith.constant 0 : i32
    return %c0_i32, %c0_i32_0 : i32, i32
  }
  func.func @transform_2(%arg0: i32, %arg1: memref<1xi32, #tpu.memory_space<smem>>) -> (i32, i32) {
    %c0_i32 = arith.constant 0 : i32
    %c0_i32_0 = arith.constant 0 : i32
    %c0_i32_1 = arith.constant 0 : i32
    return %c0_i32, %c0_i32_0 : i32, i32
  }
  func.func @transform_3(%arg0: i32, %arg1: memref<1xi32, #tpu.memory_space<smem>>) -> (i32, i32, i32) {
    %c0 = arith.constant 0 : index
    %0 = memref.load %arg1[%c0] : memref<1xi32, #tpu.memory_space<smem>>
    %c0_i32 = arith.constant 0 : i32
    %c0_i32_0 = arith.constant 0 : i32
    %c0_i32_1 = arith.constant 0 : i32
    return %0, %c0_i32, %c0_i32_0 : i32, i32, i32
  }
  func.func @transform_4(%arg0: i32, %arg1: memref<1xi32, #tpu.memory_space<smem>>) -> (i32, i32, i32) {
    %c0 = arith.constant 0 : index
    %0 = memref.load %arg1[%c0] : memref<1xi32, #tpu.memory_space<smem>>
    %c0_i32 = arith.constant 0 : i32
    %c0_i32_0 = arith.constant 0 : i32
    %c0_i32_1 = arith.constant 0 : i32
    return %0, %c0_i32, %c0_i32_0 : i32, i32, i32
  }
  func.func @transform_5(%arg0: i32, %arg1: memref<1xi32, #tpu.memory_space<smem>>) -> (i32, i32) {
    %c0_i32 = arith.constant 0 : i32
    %c0_i32_0 = arith.constant 0 : i32
    return %arg0, %c0_i32 : i32, i32
  }
}

</mosaic_0001>

<bundles_post_ra>
// kernel: tpu_custom_call.1
= control target key start
LH: loop header
LB: loop body
LE: loop exit
PB: predicated region body
PF: predicated region fallthrough
CT: control target
= control target key end

     0   :  { %12 = vsyncpa [#allocation5], 0  ;;  %s538_s0 = inlined_call_operand.<no memory space> [shape: s32[1], index: 0, kind: input, shape index: {}]   ;;  %s539_s1 = inlined_call_operand.hbm [shape: f32[8,64], index: 1, kind: input, shape index: {}]   ;;  %s540_s2 = inlined_call_operand.hbm [shape: f32[64,256], index: 2, kind: input, shape index: {}]   ;;  %s541_s3 = inlined_call_operand.vmem [shape: f32[1,256], index: 3, kind: input, shape index: {}]   ;;  %s542_s4 = inlined_call_operand.hbm [shape: f32[3,256,128], index: 4, kind: input, shape index: {}]   ;;  %s543_s5 = inlined_call_operand.vmem [shape: f32[3,1,128], index: 5, kind: input, shape index: {}]   ;;  %s544_s6 = inlined_call_operand.hbm [shape: f32[8,128], index: 6, kind: output, shape index: {}]  }
   0x1   :  { %13 = vsyncpa [#allocation8], 0 }
   0x2   :  { %14 = vsyncpa [#allocation6], 0  ;;  %s455_s21 = smov [#allocation7]  }
   0x3   :  { %s30_s22 = sshll.u32 %s455_s21, 4  ;;  %s31_s22 = int_to_ptr.vmem [resolvable:$true] %s30_s22 }
   0x4   :  { %s375_s23 = scalar_lea.vmem %s31_s22, 2048  ;;  %p380_p1 = scmp.lt.s32.totalorder %s31_s22, %s31_s22 }
   0x5   :  { %p376_p0 = scmp.ne.s32.totalorder %s31_s22, %s375_s23  ;;  %p381_p2 = scmp.lt.s32.totalorder %s375_s23, %s375_s23 }
   0x7   :  { %p382_p3 = por %p381_p2, %p380_p1 }
   0x9   :  { %p383_p4 = pnand %p382_p3, %p376_p0 }
   0xb   :  { %386 = shalt.err (!%p383_p4)
}
   0xc   :  { %s456_s24 = smov 256   ;;  %s457_s25 = smov 16  }
   0xd   :  { %36 = dma.hbm_to_vmem [thread:$0]  %s540_s2, 2048, %s31_s22, [#allocation8], %s456_s24, %s456_s24, %s457_s25  }
   0xe   :  { %s458_s28 = smov [#allocation4]   ;;  %s322_s8 = sshll.u32 %s538_s0, 12 }
   0xf   :  { %s21_s29 = sshll.u32 %s458_s28, 4  ;;  %s508_s11 = scalar_lea.hbm %s542_s4, %s322_s8  ;;  %s22_s29 = int_to_ptr.vmem [resolvable:$true] %s21_s29 }
  0x10   :  { %s395_s12 = scalar_lea.vmem %s22_s29, 128  ;;  %p400_p6 = scmp.lt.s32.totalorder %s22_s29, %s22_s29 }
  0x11   :  { %p396_p5 = scmp.ne.s32.totalorder %s22_s29, %s395_s12  ;;  %p401_p7 = scmp.lt.s32.totalorder %s395_s12, %s395_s12 }
  0x13   :  { %p402_p8 = por %p401_p7, %p400_p6 }
  0x15   :  { %p403_p9 = pnand %p402_p8, %p396_p5 }
  0x17   :  { %406 = shalt.err (!%p403_p9)
}
  0x18   :  { %24 = dma.hbm_to_vmem [thread:$0]  %s539_s1, 128, %s22_s29, [#allocation5]  }
  0x19   :  { %s459_s14 = smov [#allocation9]   ;;  %s407_s16 = scalar_lea.hbm %s508_s11, 4096 }
  0x1a   :  { %s48_s15 = sshll.u32 %s459_s14, 4  ;;  %p408_p10 = scmp.ne.s32.totalorder %s508_s11, %s407_s16  ;;  %s49_s15 = int_to_ptr.vmem [resolvable:$true] %s48_s15 }
  0x1b   :  { %s409_s19 = scalar_lea.hbm %s542_s4, 12288  ;;  %p410_p11 = scmp.lt.s32.totalorder %s508_s11, %s542_s4 }
  0x1c   :  { %p411_p12 = scmp.lt.s32.totalorder %s409_s19, %s407_s16 }
  0x1e   :  { %p412_p13 = por %p411_p12, %p410_p11 }
  0x20   :  { %p413_p0 = pnand %p412_p13, %p408_p10 }
  0x22   :  { %416 = shalt.err (!%p413_p0)
}
  0x23   :  { %s417_s22 = scalar_lea.vmem %s49_s15, 4096  ;;  %p422_p2 = scmp.lt.s32.totalorder %s49_s15, %s49_s15 }
  0x24   :  { %p418_p1 = scmp.ne.s32.totalorder %s49_s15, %s417_s22  ;;  %p423_p3 = scmp.lt.s32.totalorder %s417_s22, %s417_s22 }
  0x26   :  { %p424_p4 = por %p423_p3, %p422_p2 }
  0x28   :  { %p425_p5 = pnand %p424_p4, %p418_p1 }
  0x2a   :  { %428 = shalt.err (!%p425_p5)
}
  0x2b   :  { %s460_s1 = smov 128   ;;  %s461_s23 = smov 8  }
  0x2c   :  { %54 = dma.hbm_to_vmem [thread:$0]  %s508_s11, 4096, %s49_s15, [#allocation8], %s460_s1, %s460_s1, %s461_s23  }
  0x2d   :  { %449 = dma.done.wait [#allocation5], 128  }
  0x2e   :  { %450 = vsyncadd [#allocation5], 4294967168 }
  0x2f   :  { %451 = dma.done.wait [#allocation8], 6144  }
  0x30   :  { %452 = vsyncadd [#allocation8], 4294961152  ;;  %v462_v0 = vmov 0.0   ;;  %v97_v1 = vld [vmem:[#allocation7 + $0x78] sm:$0xff]  ;;  %v96_v2 = vld [vmem:[#allocation7 + $0x70] sm:$0xff]  ;;  %vm110_vm0 = vcmask 523264   ;;  %v100_v50 = vlaneseq }
  0x31   :  { %178 = vmatprep.mubr.f32.mxu0 %v462_v0  ;;  %v95_v3 = vld [vmem:[#allocation7 + $0x68] sm:$0xff]  ;;  %130 = vmatprep.subr.mxu0 %v97_v1  ;;  %v94_v4 = vld [vmem:[#allocation7 + $0x60] sm:$0xff]  ;;  %v93_v5 = vld [vmem:[#allocation7 + $0x58] sm:$0xff]  ;;  %p77_p6 = scmp.lt.s32.totalorder %s538_s0, 2  ;;  %s463_s7 = smov [#allocation10]  }
  0x32   :  { %131 = vmatpush1.msra.mxu0 %v96_v2  ;;  %v92_v6 = vld [vmem:[#allocation7 + $0x50] sm:$0xff]  ;;  %v91_v7 = vld [vmem:[#allocation7 + $0x48] sm:$0xff]  ;;  %v90_v8 = vld [vmem:[#allocation7 + $0x40] sm:$0xff]  ;;  %v101_v51 = vshrl.u32 %v100_v50, 7  ;;  %s303_s8 = sshll.u32 %s463_s7, 4  ;;  %s304_s8 = int_to_ptr.vmem [resolvable:$true] %s303_s8 }
  0x33   :  { %132 = vmatprep.subr.mxu0 %v95_v3  ;;  %v89_v9 = vld [vmem:[#allocation7 + $0x38] sm:$0xff]  ;;  %v217_v12 = vld [vmem:[#allocation9 + $0xf0] sm:$0xff]  ;;  %v216_v15 = vld [vmem:[#allocation9 + $0xe8] sm:$0xff]  ;;  %s546_s0 = smov (!%p77_p6, %s538_s0), 2  ;;  %s429_s9 = scalar_lea.vmem %s304_s8, 128 }
  0x34   :  { %133 = vmatpush1.msra.mxu0 %v94_v4  ;;  %v218_v10 = vld [vmem:[#allocation9 + $0xf8] sm:$0xff]  ;;  %v201_v13 = vld [vmem:[#allocation9 + $0x70] sm:$0xff]  ;;  %v87_v16 = vld [vmem:[#allocation7 + $0x28] sm:$0xff]  ;;  %v102_v52 = vsub.s32 0, %v101_v51  ;;  %v106_v54 = vsub.s32 1, %v101_v51  ;;  %s79_s30 = scalar_lea.vmem %s543_s5, %s546_s0  ;;  %p430_p7 = scmp.ne.s32.totalorder %s304_s8, %s429_s9 }
  0x35   :  { %134 = vmatprep.subr.mxu0 %v93_v5  ;;  %323 = vmatprep.subr.mxu1 %v218_v10  ;;  %v202_v11 = vld [vmem:[#allocation9 + $0x78] sm:$0xff]  ;;  %v88_v14 = vld [vmem:[#allocation7 + $0x30] sm:$0xff]  ;;  %v200_v17 = vld [vmem:[#allocation9 + $0x68] sm:$0xff]  ;;  %p434_p8 = scmp.lt.s32.totalorder %s304_s8, %s304_s8  ;;  %p435_p9 = scmp.lt.s32.totalorder %s429_s9, %s429_s9 }
  0x36   :  { %135 = vmatpush1.msra.mxu0 %v92_v6  ;;  %324 = vmatpush3.msra.mxu1 %v202_v11  ;;  %v86_v18 = vld [vmem:[#allocation7 + $0x20] sm:$0xff]  ;;  %v85_v20 = vld [vmem:[#allocation7 + $0x18] sm:$0xff]  ;;  %v84_v22 = vld [vmem:[#allocation7 + $0x10] sm:$0xff] }
  0x37   :  { %136 = vmatprep.subr.mxu0 %v91_v7  ;;  %325 = vmatprep.subr.mxu1 %v217_v12  ;;  %v215_v19 = vld [vmem:[#allocation9 + $0xe0] sm:$0xff]  ;;  %v214_v23 = vld [vmem:[#allocation9 + $0xd8] sm:$0xff]  ;;  %v83_v24 = vld [vmem:[#allocation7 + $0x8] sm:$0xff]  ;;  %p436_p10 = por %p435_p9, %p434_p8 }
  0x38   :  { %137 = vmatpush1.msra.mxu0 %v90_v8  ;;  %326 = vmatpush3.msra.mxu1 %v201_v13  ;;  %v199_v21 = vld [vmem:[#allocation9 + $0x60] sm:$0xff]  ;;  %v198_v25 = vld [vmem:[#allocation9 + $0x58] sm:$0xff]  ;;  %v213_v27 = vld [vmem:[#allocation9 + $0xd0] sm:$0xff] }
  0x39   :  { %138 = vmatprep.subr.mxu0 %v89_v9  ;;  %327 = vmatprep.subr.mxu1 %v216_v15  ;;  %v82_v26 = vld [vmem:[#allocation7] sm:$0xff]  ;;  %v81_v28 = vld [vmem:[#allocation4] sm:$0xff]  ;;  %v197_v29 = vld [vmem:[#allocation9 + $0x50] sm:$0xff]  ;;  %p437_p11 = pnand %p436_p10, %p430_p7 }
  0x3a   :  { %139 = vmatpush1.msra.mxu0 %v88_v14  ;;  %328 = vmatpush3.msra.mxu1 %v200_v17  ;;  %v212_v30 = vld [vmem:[#allocation9 + $0xc8] sm:$0xff]  ;;  %v211_v32 = vld [vmem:[#allocation9 + $0xc0] sm:$0xff]  ;;  %v210_v34 = vld [vmem:[#allocation9 + $0xb8] sm:$0xff] }
  0x3b   :  { %140 = vmatprep.subr.mxu0 %v87_v16  ;;  %329 = vmatprep.subr.mxu1 %v215_v19  ;;  %v196_v31 = vld [vmem:[#allocation9 + $0x48] sm:$0xff]  ;;  %v195_v33 = vld [vmem:[#allocation9 + $0x40] sm:$0xff]  ;;  %v194_v35 = vld [vmem:[#allocation9 + $0x38] sm:$0xff] }
  0x3c   :  { %141 = vmatpush1.msra.mxu0 %v86_v18  ;;  %330 = vmatpush3.msra.mxu1 %v199_v21  ;;  %v209_v36 = vld [vmem:[#allocation9 + $0xb0] sm:$0xff]  ;;  %v208_v38 = vld [vmem:[#allocation9 + $0xa8] sm:$0xff]  ;;  %v207_v40 = vld [vmem:[#allocation9 + $0xa0] sm:$0xff] }
  0x3d   :  { %142 = vmatprep.subr.mxu0 %v85_v20  ;;  %331 = vmatprep.subr.mxu1 %v214_v23  ;;  %v193_v37 = vld [vmem:[#allocation9 + $0x30] sm:$0xff]  ;;  %v192_v39 = vld [vmem:[#allocation9 + $0x28] sm:$0xff]  ;;  %v191_v41 = vld [vmem:[#allocation9 + $0x20] sm:$0xff] }
  0x3e   :  { %143 = vmatpush1.msra.mxu0 %v84_v22  ;;  %332 = vmatpush3.msra.mxu1 %v198_v25  ;;  %v206_v42 = vld [vmem:[#allocation9 + $0x98] sm:$0xff]  ;;  %v205_v44 = vld [vmem:[#allocation9 + $0x90] sm:$0xff]  ;;  %v204_v46 = vld [vmem:[#allocation9 + $0x88] sm:$0xff] }
  0x3f   :  { %144 = vmatprep.subr.mxu0 %v83_v24  ;;  %333 = vmatprep.subr.mxu1 %v213_v27  ;;  %v190_v43 = vld [vmem:[#allocation9 + $0x18] sm:$0xff]  ;;  %v189_v45 = vld [vmem:[#allocation9 + $0x10] sm:$0xff]  ;;  %v188_v47 = vld [vmem:[#allocation9 + $0x8] sm:$0xff] }
  0x40   :  { %145 = vmatpush1.msra.mxu0 %v82_v26  ;;  %334 = vmatpush3.msra.mxu1 %v197_v29  ;;  %v203_v48 = vld [vmem:[#allocation9 + $0x80] sm:$0xff]  ;;  %v98_v53 = vld [vmem:[%s541_s3] sm:$0x3] }
  0x41   :  { %320 = vmatmul.mubr.msk.f32.vlgmr.msra.gmra.mxu0 %vm110_vm0, %v81_v28  ;;  %335 = vmatprep.subr.mxu1 %v212_v30  ;;  %v187_v49 = vld [vmem:[#allocation9] sm:$0xff]  ;;  %v103_v55 = vrot.slane %v98_v53, %v102_v52  ;;  %v107_v56 = vrot.slane %v98_v53, %v106_v54  ;;  %v321_v0 = vld [vmem:[%s79_s30] ss:$0 sm:$0xff] }
  0x42   :  { %336 = vmatpush3.msra.mxu1 %v196_v31 }
  0x43   :  { %337 = vmatprep.subr.mxu1 %v211_v32 }
  0x44   :  { %338 = vmatpush3.msra.mxu1 %v195_v33 }
  0x45   :  { %339 = vmatprep.subr.mxu1 %v210_v34 }
  0x46   :  { %340 = vmatpush3.msra.mxu1 %v194_v35 }
  0x47   :  { %341 = vmatprep.subr.mxu1 %v209_v36 }
  0x48   :  { %342 = vmatpush3.msra.mxu1 %v193_v37 }
  0x49   :  { %343 = vmatprep.subr.mxu1 %v208_v38 }
  0x4a   :  { %344 = vmatpush3.msra.mxu1 %v192_v39 }
  0x4b   :  { %345 = vmatprep.subr.mxu1 %v207_v40 }
  0x4c   :  { %346 = vmatpush3.msra.mxu1 %v191_v41 }
  0x4d   :  { %347 = vmatprep.subr.mxu1 %v206_v42 }
  0x4e   :  { %348 = vmatpush3.msra.mxu1 %v190_v43 }
  0x4f   :  { %349 = vmatprep.subr.mxu1 %v205_v44 }
  0x50   :  { %350 = vmatpush3.msra.mxu1 %v189_v45 }
  0x51   :  { %351 = vmatprep.subr.mxu1 %v204_v46 }
  0x52   :  { %352 = vmatpush3.msra.mxu1 %v188_v47 }
  0x53   :  { %353 = vmatprep.subr.mxu1 %v203_v48 }
  0x54   :  { %354 = vmatpush3.msra.mxu1 %v187_v49 }
 0x101   :  { %v180_v57 = vpop.f32.mrf.mxu0 }
 0x102   :  { %v181_v58 = vadd.f32 %v180_v57, %v103_v55 }
 0x103   :  { %v182_v59 = vpop.f32.mrf.mxu0 }
 0x104   :  { %v183_v60 = vadd.f32 %v182_v59, %v107_v56  ;;  %v185_v62 = vmax.f32 %v181_v58, 0.0 }
 0x106   :  { %v186_v61 = vmax.f32 %v183_v60, 0.0 }
 0x108   :  { %290 = vmatprep.mubr.f32.mxu1 %v186_v61 }
 0x109   :  { %291 = vmatmul.mubr.f32.vlgmr.msra.gmra.mxu1 %v185_v62 }
 0x1c9   :  { %v355_v63 = vpop.f32.mrf.mxu1 }
 0x1cb   :  { %v356_v1 = vpop.f32.mrf.mxu1 }
 0x1cc   :  { %v357_v2 = vadd.f32 %v356_v1, %v355_v63 }
 0x1ce   :  { %v293_v3 = vadd.f32 %v357_v2, %v321_v0 }
 0x1d0   :  { %296 = vst [vmem:[#allocation10] sm:$0xff] %v293_v3 }
 0x1d1   :  { %440 = shalt.err (!%p437_p11)
}
 0x1d2   :  { %306 = dma.vmem_to_hbm [thread:$0]  %s304_s8, 128, %s544_s6, [#allocation6]  }
 0x1d3   :  { %453 = dma.done.wait [#allocation6], 128  }
 0x1d4   :  { %454 = vsyncadd [#allocation6], 4294967168 }
 0x1d5   :  { %310 = vsyncpa [#allocation5], 1 }
 0x1d6   :  { %311 = vsyncpa [#allocation8], 1 }
 0x1d7   :  { %312 = vsyncpa [#allocation6], 1 }

</bundles_post_ra>
